<compile_context>
chip_gen: v5e
topology: v5e:2x2
jax: 0.10.0
libtpu: 0.0.40
codegen_flags: <defaults>
</compile_context>

<pallas_src>
import jax
import jax.numpy as jnp
from jax import lax
from jax.experimental import pallas as pl
from jax.experimental.pallas import tpu as pltpu


def _norm_kernel(scale_ref, x_ref, o_ref):
    # x_ref block: (1, C, T) -- one batch element, one spatial tile.
    x = x_ref[...].astype(jnp.float32)
    # Sum of squares over the channel axis -> (1, 1, T).
    ssq = jnp.sum(x * x, axis=1, keepdims=True)
    # Fold the learned scalar into the (1, 1, T) rsqrt vector; per-element work
    # after this is a single VPU multiply.
    inv = scale_ref[0] * lax.rsqrt(ssq)
    o_ref[...] = (x * inv).astype(o_ref.dtype)


def _round_up(x, m):
    return ((x + m - 1) // m) * m


def _cdiv(a, b):
    return -(-a // b)


def _choose_tile(n, c, hw, itemsize, target_tile_bytes):
    """Pick the spatial tile T (lanes) and whether to deepen the input pipeline.

    Accounts for channel sublane padding (round_up(C, 8)) so the VMEM byte
    budget is not optimistic for small C.
    """
    c_pad = _round_up(c, 8)
    full_tile_bytes = c_pad * _round_up(hw, 128) * itemsize
    deep_pipeline = False

    if hw <= 128 or full_tile_bytes <= target_tile_bytes:
        # Full-HW tile: one fully contiguous DMA per (batch, tile) grid step.
        if n >= 2 or hw < 256:
            return hw, deep_pipeline
        # Batch 1: split spatially so both v7x TensorCores get work (megacore).
        t = max(128, _round_up(_cdiv(hw, 2), 128))
        return t, deep_pipeline

    # Spatial tiling: T a multiple of 128, sized by the byte budget.
    t = (target_tile_bytes // (c_pad * itemsize)) // 128 * 128
    if t < 128:
        # Huge C forces the minimum tile width; hide strided-DMA latency with a
        # deeper input pipeline instead of shrinking further.
        t = 128
        deep_pipeline = True
    else:
        # Keep each strided DMA row >= ~1 KiB contiguous (matters for bf16).
        t = max(t, _round_up(_cdiv(1024, itemsize), 128))
    t = min(t, max((hw // 128) * 128, 128))
    return t, deep_pipeline


def norm_layer(x_nchw, scale, *, target_tile_bytes=2 << 20):
    """L2-normalize over the channel dim of an NCHW tensor and scale.

    x_nchw: (N, C, H, W) array (f32 or bf16); scale: (1,) f32.
    target_tile_bytes: per-tile byte budget (~1-4 MiB keeps the pipeline at
      85%+ of the HBM roofline across chip generations while fitting the
      scoped-VMEM limits of v5e/v6e/v7x).
    """
    N, C, H, W = x_nchw.shape
    HW = H * W
    itemsize = int(jnp.dtype(x_nchw.dtype).itemsize)

    T, deep_pipeline = _choose_tile(N, C, HW, itemsize, target_tile_bytes)
    grid = (N, _cdiv(HW, T))

    x = x_nchw.reshape(N, C, HW)

    if deep_pipeline:
        x_spec = pl.BlockSpec((1, C, T), lambda n, t: (n, 0, t),
                              pipeline_mode=pl.Buffered(3))
    else:
        x_spec = pl.BlockSpec((1, C, T), lambda n, t: (n, 0, t))

    # Explicit VMEM budget: ~2x in + 2x out buffers + f32 temps ~= 6-10x tile.
    c_pad = _round_up(C, 8)
    tile_f32_bytes = c_pad * _round_up(T, 128) * 4
    vmem_limit = int(min(64 * 1024 * 1024,
                         max(32 * 1024 * 1024, 10 * tile_f32_bytes)))

    out = pl.pallas_call(
        _norm_kernel,
        out_shape=jax.ShapeDtypeStruct((N, C, HW), x.dtype),
        grid_spec=pltpu.PrefetchScalarGridSpec(
            num_scalar_prefetch=0,
            grid=grid,
            in_specs=[
                # Learned scalar lives in SMEM (untiled).
                pl.BlockSpec(memory_space=pltpu.MemorySpace.SMEM),
                # (1, C, T) activation tile; full channel extent per block.
                x_spec,
            ],
            out_specs=pl.BlockSpec((1, C, T), lambda n, t: (n, 0, t)),
        ),
        compiler_params=pltpu.CompilerParams(
            # Both axes independent -> shard across TensorCores (v7x megacore).
            dimension_semantics=("parallel", "parallel"),
            vmem_limit_bytes=vmem_limit,
        ),
        cost_estimate=pl.CostEstimate(
            flops=3 * N * C * HW,
            transcendentals=N * HW,
            bytes_accessed=2 * N * C * HW * itemsize,
        ),
    )(scale, x)

    return out.reshape(N, C, H, W)


def _reference(x, scale):
    xf = x.astype(jnp.float32)
    norm = jnp.sqrt(jnp.sum(xf * xf, axis=1, keepdims=True))
    return (scale[0] * xf / norm).astype(x.dtype)


if __name__ == "__main__":
    key = jax.random.PRNGKey(0)
    k1, k2, k3 = jax.random.split(key, 3)

    # Deterministic parameter init, matching nn.Parameter(torch.ones(1)).
    scale = jnp.ones((1,), dtype=jnp.float32)

    # Case 1: f32, HW a multiple of 128 (full-HW contiguous tile).
    x1 = jax.random.normal(k1, (2, 4, 16, 16), dtype=jnp.float32)
    o1 = jax.block_until_ready(norm_layer(x1, scale))
    r1 = _reference(x1, scale)
    assert o1.shape == x1.shape
    assert jnp.allclose(o1, r1, atol=1e-5, rtol=1e-5), "mismatch (f32, 16x16)"

    # Case 2: f32, ragged spatial extent -> block equals full array extent
    # (no padding pass, no output slice).
    x2 = jax.random.normal(k2, (2, 4, 14, 14), dtype=jnp.float32)
    o2 = jax.block_until_ready(norm_layer(x2, scale))
    r2 = _reference(x2, scale)
    assert o2.shape == x2.shape
    assert jnp.allclose(o2, r2, atol=1e-5, rtol=1e-5), "mismatch (f32, 14x14)"

    # Case 3: bf16, batch 1, HW not divisible by the 128-lane tile
    # (exercises the megacore spatial split and ragged-boundary masked writes).
    x3 = jax.random.normal(k3, (1, 8, 38, 38), dtype=jnp.bfloat16)
    o3 = jax.block_until_ready(norm_layer(x3, scale))
    r3 = _reference(x3, scale)
    assert o3.shape == x3.shape and o3.dtype == jnp.bfloat16
    assert jnp.allclose(o3.astype(jnp.float32), r3.astype(jnp.float32),
                        atol=2e-2, rtol=2e-2), "mismatch (bf16, 38x38)"

    print("KERNEL_OK")
</pallas_src>

<mosaic_0001>
module attributes {stable_mosaic.version = 11 : i64} {
  func.func @_norm_kernel(%arg0: i32, %arg1: i32, %arg2: memref<1xf32, #tpu.memory_space<smem>>, %arg3: memref<1x4x256xf32, #tpu.memory_space<vmem>>, %arg4: memref<1x4x256xf32, #tpu.memory_space<vmem>>) attributes {dimension_semantics = [#tpu.dimension_semantics<parallel>, #tpu.dimension_semantics<parallel>], iteration_bounds = array<i64: 2, 1>, scalar_prefetch = 0 : i64, scratch_operands = 0 : i64, tpu.core_type = #tpu.core_type<tc>, window_params = [{transform_indices = @transform_0, window_bounds = array<i64: 1>}, {transform_indices = @transform_1, window_bounds = array<i64: 1, 4, 256>}, {transform_indices = @transform_2, window_bounds = array<i64: 1, 4, 256>}]} {
    %c0 = arith.constant 0 : index
    %c0_0 = arith.constant 0 : index
    %c0_1 = arith.constant 0 : index
    %0 = vector.load %arg3[%c0, %c0_0, %c0_1] : memref<1x4x256xf32, #tpu.memory_space<vmem>>, vector<1x4x256xf32>
    %1 = arith.mulf %0, %0 : vector<1x4x256xf32>
    %cst = arith.constant dense<0.000000e+00> : vector<1x256xf32>
    %2 = vector.multi_reduction <add>, %1, %cst [1] : vector<1x4x256xf32> to vector<1x256xf32>
    %3 = vector.shape_cast %2 : vector<1x256xf32> to vector<1x1x256xf32>
    %c0_2 = arith.constant 0 : index
    %4 = memref.load %arg2[%c0_2] : memref<1xf32, #tpu.memory_space<smem>>
    %5 = math.rsqrt %3 : vector<1x1x256xf32>
    %6 = vector.broadcast %4 : f32 to vector<1x1x256xf32>
    %7 = arith.mulf %6, %5 : vector<1x1x256xf32>
    %8 = vector.broadcast %7 : vector<1x1x256xf32> to vector<1x4x256xf32>
    %9 = arith.mulf %0, %8 : vector<1x4x256xf32>
    %c0_3 = arith.constant 0 : index
    %c0_4 = arith.constant 0 : index
    %c0_5 = arith.constant 0 : index
    %10 = vector.load %arg4[%c0_3, %c0_4, %c0_5] : memref<1x4x256xf32, #tpu.memory_space<vmem>>, vector<1x4x256xf32>
    tpu.vector_store %arg4[%c0_3, %c0_4, %c0_5], %9 {strides = array<i32>} : memref<1x4x256xf32, #tpu.memory_space<vmem>>, vector<1x4x256xf32>,
    return
  }
  func.func @transform_0(%arg0: i32, %arg1: i32) -> i32 {
    %c0_i32 = arith.constant 0 : i32
    %c0_i32_0 = arith.constant 0 : i32
    return %c0_i32 : i32
  }
  func.func @transform_1(%arg0: i32, %arg1: i32) -> (i32, i32, i32) {
    %c0_i32 = arith.constant 0 : i32
    %c0_i32_0 = arith.constant 0 : i32
    return %arg0, %c0_i32, %arg1 : i32, i32, i32
  }
  func.func @transform_2(%arg0: i32, %arg1: i32) -> (i32, i32, i32) {
    %c0_i32 = arith.constant 0 : i32
    %c0_i32_0 = arith.constant 0 : i32
    return %arg0, %c0_i32, %arg1 : i32, i32, i32
  }
}

</mosaic_0001>

<bundles_post_ra>
// kernel: tpu_custom_call.1
= control target key start
LH: loop header
LB: loop body
LE: loop exit
PB: predicated region body
PF: predicated region fallthrough
CT: control target
= control target key end

     0   :  { %s682_s0 = inlined_call_operand.<no memory space> [shape: f32[1], index: 0, kind: input, shape index: {}]   ;;  %s683_s1 = inlined_call_operand.hbm [shape: f32[2,4,256], index: 1, kind: input, shape index: {}]   ;;  %s684_s2 = inlined_call_operand.hbm [shape: f32[2,4,256], index: 2, kind: output, shape index: {}]  }
   0x1   :  { %7 = sst [smem:[#allocation2]] %s682_s0 }
   0x2   :  { %8 = vsyncpa [#allocation4], 0 }
   0x3   :  { %10 = vsyncpa [#allocation4 + $0x1], 0 }
   0x4   :  { %11 = vsyncpa [#allocation5], 0 }
   0x5   :  { %13 = vsyncpa [#allocation5 + $0x1], 0  ;;  %s555_s11 = smov 0   ;;  %s557_s12 = smov 0  }
   0x6   :  { %s559_s13 = smov 0   ;;  %s561_s14 = smov 0  }
   0x7   :  { %s563_s15 = smov 0   ;;  %s565_s16 = smov 0  }
   0x8 LB: > { %s340_s0 = sadd.s32 4294967295, %s535_s16   ;;  %s341_s17 = sadd.s32 4294967294, %s535_s16   ;;  %s535_s16 = sphi %s565_s16, %s19_s16   ;;  %s531_s15 = sphi %s563_s15, %s693_s15   ;;  %s527_s14 = sphi %s561_s14, %s692_s14   ;;  %s523_s13 = sphi %s559_s13, %s691_s13   ;;  %s519_s12 = sphi %s557_s12, %s690_s12   ;;  %s515_s11 = sphi %s555_s11, %s689_s11  }
   0x9   : > { %s31_s18 = sadd.s32 1, %s531_s15  ;;  %s61_s19 = sadd.s32 1, %s523_s13 }
   0xa   : > { %p33_p0 = scmp.ge.s32.totalorder %s31_s18, 2  ;;  %p68_p1 = scmp.ne.s32.totalorder %s523_s13, %s519_s12 }
   0xb   : > { %p69_p2 = scmp.eq.s32.totalorder %s535_s16, 0  ;;  %p74_p3 = scmp.ne.s32.totalorder %s519_s12, %s515_s11 }
   0xc   : > { %s695_s18 = smov (%p33_p0, %s31_s18), 0  ;;  %p75_p5 = scmp.eq.s32.totalorder %s340_s0, 0 }
   0xd   : > { %p596_p4 = por %p69_p2, %p68_p1  ;;  %s56_s21 = ssub.s32 %s531_s15, %s695_s18 }
   0xe   : > { %p100_p6 = scmp.eq.s32.totalorder %s340_s0, 1  ;;  %p59_p7 = scmp.eq.s32.totalorder %s56_s21, 0 }
   0xf   : > { %p602_p8 = por %p75_p5, %p74_p3  ;;  %p106_p10 = scmp.eq.s32.totalorder %s341_s17, 1 }
  0x10   : > { %p606_p9 = por %p100_p6, %p68_p1  ;;  %p343_p12 = scmp.ge.s32.totalorder %s535_s16, 2 }
  0x11   : > { %s611_s24 = scalar_select %p59_p7, %s523_s13, %s61_s19  }
  0x12   : > { %p613_p11 = por %p106_p10, %p74_p3  ;;  %p369_p13 = scmp.lt.s32.totalorder %s535_s16, 2 }
  0x13   : > { %s129_s26 = sand.u32 1, %s523_s13   ;;  %s355_s28 = sshll.u32 %s531_s15, 3 }
  0x14   : > { %s344_s27 = sshll.u32 %s129_s26, 3  ;;  %s140_s3 = scalar_lea.hbm %s683_s1, %s355_s28 }
  0x15   : > { %s133_s4 = scalar_lea.vmem [#allocation3], %s344_s27  ;;  %s142_s6 = sshll.u32 %s140_s3, 4  ;;  %s143_s6 = int_to_ptr.hbm [resolvable:$true] %s142_s6 }
  0x16   : > { %s144_s5 = sshll.u32 %s133_s4, 4  ;;  %p362_p0 = pnand %p369_p13, %p596_p4  ;;  %s145_s5 = int_to_ptr.vmem [resolvable:$true] %s144_s5 }
  0x17   : > { %p347_p1 = scmp.ge.s32.totalorder %s535_s16, 1  ;;  %p149_p2 = scmp.lt.s32.totalorder %s535_s16, 3 }
  0x18   : > { %s130_s7 = scalar_lea.sflag [#allocation4], %s129_s26 }
  0x19   : > { %364 = dma.hbm_to_vmem [thread:$0]  (!%p362_p0), %s143_s6, 128, %s145_s5, %s130_s7  }
  0x1a   : > { %p150_p3 = pnand %p347_p1, %p149_p2 }
  0x1b   : > { %s629_s8 = sand.u32 (!%p150_p3), 1, %s519_s12  }
  0x1c   : > { %153 = sbr.rel (%p150_p3) target bundleno = 87 (0x57), region = 28  ;;  %s348_s9 = sshll.u32 (!%p150_p3), %s629_s8, 3 }
  0x1d   : > { %s156_s10 = scalar_lea.sflag (!%p150_p3), [#allocation4], %s629_s8  ;;  %s159_s0 = scalar_lea.vmem (!%p150_p3), [#allocation3], %s348_s9 }
  0x21   : > { %506 = dma.done.wait (%p602_p8), %s156_s10, 128  }
  0x22   : > { %508 = vsyncadd (%p602_p8), %s156_s10, 4294967168  ;;  %v183_v0 = vld [vmem:[%s159_s0] sm:$0xff]  ;;  %vm191_vm0 = vcmask 1043456   ;;  %s206_s17 = sld [smem:[#allocation2]]  ;;  %s356_s19 = sshll.u32 %s527_s14, 3 }
  0x23   : > { %v184_v1 = vmul.f32 %v183_v0, %v183_v0  ;;  %s251_s22 = scalar_lea.hbm %s684_s2, %s356_s19  ;;  %s180_s26 = scalar_lea.vmem [#allocation6], %s348_s9 }
  0x24   : > { %s253_s27 = sshll.u32 %s180_s26, 4  ;;  %s255_s14 = sshll.u32 %s251_s22, 4  ;;  %s254_s27 = int_to_ptr.vmem [resolvable:$true] %s253_s27  ;;  %s256_s14 = int_to_ptr.hbm [resolvable:$true] %s255_s14 }
  0x25   : > { %186 = vst [vmem:[#allocation1] ss:$2 sm:$0xff] %v184_v1  ;;  %s238_s28 = scalar_lea.sflag [#allocation5], %s629_s8  ;;  %s467_s29 = sshra.s32 %s256_s14, 4  ;;  %s468_s29 = int_to_ptr.hbm [resolvable:$true] %s467_s29 }
  0x26   : > { %s469_s30 = scalar_lea.hbm %s468_s29, 8  ;;  %s473_s5 = scalar_lea.hbm %s684_s2, 16 }
  0x27   : > { %p470_p4 = scmp.ne.s32.totalorder %s468_s29, %s469_s30  ;;  %p474_p7 = scmp.lt.s32.totalorder %s468_s29, %s684_s2 }
  0x28   : > { %v227_v30 = vstv %s206_s17  ;;  %p475_p8 = scmp.lt.s32.totalorder %s473_s5, %s469_s30 }
  0x29   : > { %p471_p5 = pnand %p470_p4, %p606_p9 }
  0x2a   : > { %p476_p10 = por %p475_p8, %p474_p7 }
  0x2b   : > { %p472_p6 = pneg %p471_p5 }
  0x2c   : > { %v187_v2 = vld.sshfl [vmem:[#allocation1] sm:$0xff pattern:$0x75316420]  ;;  %v188_v3 = vld.sshfl [vmem:[#allocation1 + $0x8] sm:$0xff pattern:$0x75316420] }
  0x2d   : > { %v192_v4 = vsel %vm191_vm0, %v187_v2, 0.0  ;;  %v199_v5 = vsel %vm191_vm0, %v188_v3, 0.0  ;;  %p477_p13 = pnand %p476_p10, %p472_p6 }
  0x2e   : > { %v193_v6 = vrot.slane %v192_v4, 4  ;;  %v200_v7 = vrot.slane %v199_v5, 4 }
  0x30   : > { %v194_v8 = vadd.f32 %v193_v6, %v192_v4  ;;  %v201_v9 = vadd.f32 %v200_v7, %v199_v5 }
  0x32   : > { %v195_v10 = vrot.slane %v194_v8, 2  ;;  %v202_v11 = vrot.slane %v201_v9, 2 }
  0x34   : > { %v196_v12 = vadd.f32 %v195_v10, %v194_v8  ;;  %v203_v13 = vadd.f32 %v202_v11, %v201_v9 }
  0x36   : > { %v197_v14 = vrot.slane %v196_v12, 1  ;;  %v204_v15 = vrot.slane %v203_v13, 1 }
  0x38   : > { %v198_v16 = vadd.f32 %v197_v14, %v196_v12  ;;  %v205_v17 = vadd.f32 %v204_v15, %v203_v13 }
  0x3a   : > { %419 = vrsqrt.f32 %v198_v16  ;;  %vm213_vm3 = vweird.f32 %v198_v16  ;;  %vm223_vm5 = vweird.f32 %v205_v17 }
  0x3b   : > { %421 = vrsqrt.f32 %v205_v17 }
  0x40   : > { %v420_v18 = vpop.eup %419 }
  0x41   : > { %v422_v19 = vpop.eup %421  ;;  %v208_v20 = vmul.f32 %v420_v18, %v198_v16  ;;  %vm214_vm1 = vweird.f32 %v420_v18 }
  0x42   : > { %v218_v21 = vmul.f32 %v422_v19, %v205_v17  ;;  %vm224_vm2 = vweird.f32 %v422_v19  ;;  %vm215_vm4 = vmor %vm213_vm3, %vm214_vm1 }
  0x43   : > { %v209_v22 = vmul.f32 %v420_v18, %v208_v20  ;;  %vm225_vm6 = vmor %vm223_vm5, %vm224_vm2 }
  0x44   : > { %v219_v23 = vmul.f32 %v422_v19, %v218_v21 }
  0x45   : > { %v210_v24 = vmul.f32 0.5, %v209_v22 }
  0x46   : > { %v220_v25 = vmul.f32 0.5, %v219_v23 }
  0x47   : > { %v211_v26 = vsub.f32 1.5, %v210_v24 }
  0x48   : > { %v221_v27 = vsub.f32 1.5, %v220_v25 }
  0x49   : > { %v212_v28 = vmul.f32 %v420_v18, %v211_v26 }
  0x4a   : > { %v222_v29 = vmul.f32 %v422_v19, %v221_v27 }
  0x4b   : > { %v216_v31 = vsel %vm215_vm4, %v420_v18, %v212_v28 }
  0x4c   : > { %v226_v32 = vsel %vm225_vm6, %v422_v19, %v222_v29  ;;  %v228_v34 = vmul.f32 %v227_v30, %v216_v31 }
  0x4d   : > { %v229_v33 = vmul.f32 %v227_v30, %v226_v32 }
  0x4f   : > { %v232_v35 = vrot.slane %v229_v33, 4 }
  0x51   : > { %v233_v36 = vsel %vm191_vm0, %v228_v34, %v232_v35 }
  0x52   : > { %v235_v37 = vmul.f32 %v233_v36, %v183_v0 }
  0x54   : > { %236 = vst [vmem:[%s180_s26] sm:$0xff] %v235_v37 }
  0x55   : > { %480 = shalt.err (!%p477_p13)
}
  0x56   : > { %359 = dma.vmem_to_hbm [thread:$0]  (%p606_p9), %s254_s27, 128, %s256_s14, %s238_s28  }
  0x57 PF: > { %s267_s8 = sand.u32 1, %s515_s11   ;;  %p366_p0 = pnand %p343_p12, %p613_p11 }
  0x58   : > { %s268_s9 = scalar_lea.sflag [#allocation5], %s267_s8 }
  0x59   : > { %p367_p1 = pneg %p366_p0 }
  0x5b   : > { %510 = dma.done.wait (%p367_p1), %s268_s9, 128  }
  0x5c   : > { %512 = vsyncadd (%p367_p1), %s268_s9, 4294967168  ;;  %s19_s16 = sadd.s32 1, %s535_s16   ;;  %s689_s11 = smov %s519_s12 }
  0x5d   : > { %p16_p2 = scmp.ge.s32.totalorder %s19_s16, 4   ;;  %s690_s12 = smov %s523_s13 }
  0x5e   : > { %s691_s13 = smov %s611_s24  ;;  %s692_s14 = smov %s531_s15 }
  0x5f   : > { %s693_s15 = smov %s695_s18  ;;  %18 = sbr.rel (!%p16_p2) target bundleno = 8 (0x8), region = 73 }
  0x64   :  { %274 = vsyncpa [#allocation4], 1 }
  0x65   :  { %276 = vsyncpa [#allocation4 + $0x1], 1 }
  0x66   :  { %277 = vsyncpa [#allocation5], 1 }
  0x67   :  { %279 = vsyncpa [#allocation5 + $0x1], 1 }

</bundles_post_ra>
